<compile_context>
chip_gen: v7x
topology: tpu7x:2x2x1
jax: 0.10.0
libtpu: 0.0.40
codegen_flags: <defaults>
</compile_context>

<pallas_src>
import functools

import jax
import jax.numpy as jnp
from jax.experimental import pallas as pl
from jax.experimental.pallas import tpu as pltpu


def _masked_sq_sum_kernel(x_ref, t_ref, m_ref, num_ref, *, inv_c):
    # x_ref, t_ref : (Bb, C, nh, p, W)  input dtype (bf16 / f32), upcast per channel
    # m_ref        : (Bb, nh, W) f32    mask expanded along W only (rows in a patch
    #                                   share the mask value -> handled by the p-reduce)
    # num_ref      : (Bb, 1, 1)  f32    per-sample sum_{h,w} mask_up * mean_c (x-t)^2
    C = x_ref.shape[1]
    acc = None
    for c in range(C):  # small static unroll; keeps f32 temporaries at 1/C of the tile
        d = x_ref[:, c].astype(jnp.float32) - t_ref[:, c].astype(jnp.float32)
        sq = d * d                              # (Bb, nh, p, W)
        part = jnp.sum(sq, axis=2)              # reduce p (sublane) -> (Bb, nh, W)
        acc = part if acc is None else acc + part

    masked = acc * m_ref[...]                   # (Bb, nh, W)
    tot = jnp.sum(masked, axis=2, keepdims=True)   # lane reduce    -> (Bb, nh, 1)
    tot = jnp.sum(tot, axis=1, keepdims=True)      # sublane reduce -> (Bb, 1, 1)
    num_ref[...] = tot * inv_c


def _per_batch_masked_sums(x5, t5, mw, block_b):
    """x5,t5: (Bp, C, nh, p, W) native dtype; mw: (Bp, nh, W) f32 -> num (Bp,) f32."""
    Bp, C, nh, p, W = x5.shape
    nb = Bp // block_b
    kernel = functools.partial(_masked_sq_sum_kernel, inv_c=1.0 / C)
    num = pl.pallas_call(
        kernel,
        out_shape=jax.ShapeDtypeStruct((Bp, 1, 1), jnp.float32),
        grid_spec=pltpu.PrefetchScalarGridSpec(
            num_scalar_prefetch=0,
            grid=(nb,),
            in_specs=[
                pl.BlockSpec((block_b, C, nh, p, W), lambda b: (b, 0, 0, 0, 0)),
                pl.BlockSpec((block_b, C, nh, p, W), lambda b: (b, 0, 0, 0, 0)),
                pl.BlockSpec((block_b, nh, W), lambda b: (b, 0, 0)),
            ],
            out_specs=pl.BlockSpec((block_b, 1, 1), lambda b: (b, 0, 0)),
        ),
        compiler_params=pltpu.CompilerParams(dimension_semantics=("parallel",)),
    )(x5, t5, mw)
    return num[:, 0, 0]


class MaskedMSELoss:
    """JAX/Pallas port of the PyTorch MaskedMSELoss forward."""

    def __init__(self, patch_size: int = 16, stride: int = 1, norm_pix: bool = False,
                 tile_bytes: int = 2 << 20):
        self.patch_size = patch_size
        self.stride = stride
        self.scale_factor = patch_size // stride
        self.norm_pix = norm_pix
        # ~2 MiB per input tile: 2 inputs x 2 pipeline buffers x 2 MiB = 8 MiB, safely
        # under the default scoped-VMEM limit on every generation (incl. v7x's 64 MiB).
        self.tile_bytes = tile_bytes

    # rearrange 'b c (nh p1) (nw p2) -> b (nh nw) (p1 p2 c)'
    def _patchify(self, imgs, nh, nw):
        p = self.scale_factor
        B, C, H, W = imgs.shape
        x = imgs.reshape(B, C, nh, p, nw, p)
        x = jnp.transpose(x, (0, 2, 4, 3, 5, 1))
        return x.reshape(B, nh * nw, p * p * C)

    # rearrange 'b (nh nw) (p1 p2 c) -> b c (nh p1) (nw p2)'
    def _unpatchify(self, x, nh, nw, C):
        p = self.scale_factor
        B = x.shape[0]
        x = x.reshape(B, nh, nw, p, p, C)
        x = jnp.transpose(x, (0, 5, 1, 3, 2, 4))
        return x.reshape(B, C, nh * p, nw * p)

    def __call__(self, input, target, mask=None):
        B, C, H, W = input.shape
        p = self.scale_factor
        nh, nw = H // p, W // p

        if self.norm_pix:
            # TODO(synk): fuse the per-patch mean/var normalization into the Pallas
            # kernel if norm_pix=True is ever on the hot path (the patchify/unpatchify
            # glue below costs several extra HBM round trips of the full target).
            t = self._patchify(target.astype(jnp.float32), nh, nw)
            mean = jnp.mean(t, axis=-1, keepdims=True)
            var = jnp.var(t, axis=-1, ddof=1, keepdims=True)  # torch .var() is unbiased
            t = (t - mean) / jnp.sqrt(var + 1e-6)
            target = self._unpatchify(t, nh, nw, C)

        # Free, contiguous reshapes (no transpose / no HBM round trip): H = nh * p.
        x5 = input.reshape(B, C, nh, p, W)
        t5 = target.reshape(B, C, nh, p, W)

        # Mask expanded only along W (p x smaller than the full nearest-upsampled mask).
        if mask is None:
            mw = jnp.ones((B, nh, W), jnp.float32)
        else:
            mlow = mask.reshape(B, nh, nw).astype(jnp.float32)
            mw = jnp.repeat(mlow, p, axis=2)                  # (B, nh, W)

        # Batch-block the grid so each input tile is ~tile_bytes.
        per_sample = C * H * W * input.dtype.itemsize
        bb = max(1, min(B, self.tile_bytes // per_sample))
        nb = -(-B // bb)
        if nb == 1 and B > 1 and per_sample * B > (1 << 20):
            # keep >=2 parallel grid steps when it matters (v7x has 2 TensorCores)
            bb = -(-B // 2)
            nb = -(-B // bb)
        Bp = nb * bb
        if Bp != B:
            pad = Bp - B
            x5 = jnp.pad(x5, ((0, pad),) + ((0, 0),) * 4)
            t5 = jnp.pad(t5, ((0, pad),) + ((0, 0),) * 4)
            mw = jnp.pad(mw, ((0, pad), (0, 0), (0, 0)))

        num = _per_batch_masked_sums(x5, t5, mw, bb)[:B]      # (B,) f32

        if mask is None:
            # all-ones mask -> identical to loss.mean()
            return jnp.sum(num) / (B * H * W)

        maskf = mask.astype(jnp.float32)
        den = (p * p) * jnp.sum(maskf, axis=1)                # == upsampled mask sums
        per_batch = num / den                                 # 0/0 -> NaN if a mask row is empty
        loss = jnp.nanmean(per_batch)                         # matches torch .nanmean()
        # early-return `0` branch of the PyTorch code (mask.sum() == 0)
        return jnp.where(jnp.sum(maskf) == 0.0, jnp.float32(0.0), loss)


if __name__ == "__main__":
    key = jax.random.PRNGKey(0)
    k1, k2, k3 = jax.random.split(key, 3)

    B, C, H, W = 2, 4, 16, 16
    # patch_size=16, stride=4 -> scale_factor=4, nh=nw=4
    loss_mod = MaskedMSELoss(patch_size=16, stride=4, norm_pix=False)
    p_ = loss_mod.scale_factor
    nh, nw = H // p_, W // p_

    # native bf16 inputs: the kernel streams bf16 from HBM and upcasts to f32 in VMEM
    x = jax.random.normal(k1, (B, C, H, W), jnp.bfloat16)
    t = jax.random.normal(k2, (B, C, H, W), jnp.bfloat16)
    mask = (jax.random.uniform(k3, (B, nh * nw)) > 0.5).astype(jnp.float32)

    out = jax.block_until_ready(loss_mod(x, t, mask))

    # pure-JAX reference of the PyTorch forward (masked branch), same bf16->f32 upcast
    x32, t32 = x.astype(jnp.float32), t.astype(jnp.float32)

    def ref_masked(x32, t32, mask):
        loss = (x32 - t32) ** 2
        m = mask.reshape(B, nh, nw)
        m = jnp.repeat(jnp.repeat(m, p_, axis=1), p_, axis=2)
        l = loss.mean(axis=1) * m
        l = l.reshape(B, -1).sum(-1) / m.reshape(B, -1).sum(-1)
        return jnp.nanmean(l)

    assert jnp.allclose(out, ref_masked(x32, t32, mask), rtol=1e-4, atol=1e-5)

    # unmasked branch == plain MSE mean
    out_nomask = jax.block_until_ready(loss_mod(x, t, None))
    assert jnp.allclose(out_nomask, jnp.mean((x32 - t32) ** 2), rtol=1e-4, atol=1e-5)

    # all-zero mask -> early-return 0 branch
    out_zero = jax.block_until_ready(loss_mod(x, t, jnp.zeros((B, nh * nw), jnp.float32)))
    assert out_zero == 0.0

    print("KERNEL_OK")
</pallas_src>

<mosaic_0001>
module attributes {stable_mosaic.version = 11 : i64} {
  func.func @_masked_sq_sum_kernel(%arg0: i32, %arg1: memref<2x4x4x4x16xbf16, #tpu.memory_space<vmem>>, %arg2: memref<2x4x4x4x16xbf16, #tpu.memory_space<vmem>>, %arg3: memref<2x4x16xf32, #tpu.memory_space<vmem>>, %arg4: memref<2x1x1xf32, #tpu.memory_space<vmem>>) attributes {dimension_semantics = [#tpu.dimension_semantics<parallel>], iteration_bounds = array<i64: 1>, scalar_prefetch = 0 : i64, scratch_operands = 0 : i64, tpu.core_type = #tpu.core_type<tc>, window_params = [{transform_indices = @transform_0, window_bounds = array<i64: 2, 4, 4, 4, 16>}, {transform_indices = @transform_1, window_bounds = array<i64: 2, 4, 4, 4, 16>}, {transform_indices = @transform_2, window_bounds = array<i64: 2, 4, 16>}, {transform_indices = @transform_3, window_bounds = array<i64: 2, 1, 1>}]} {
    %c0 = arith.constant 0 : index
    %c0_0 = arith.constant 0 : index
    %c0_1 = arith.constant 0 : index
    %c0_2 = arith.constant 0 : index
    %c0_3 = arith.constant 0 : index
    %0 = vector.load %arg1[%c0, %c0_0, %c0_1, %c0_2, %c0_3] : memref<2x4x4x4x16xbf16, #tpu.memory_space<vmem>>, vector<2x1x4x4x16xbf16>
    %1 = vector.shape_cast %0 : vector<2x1x4x4x16xbf16> to vector<2x4x4x16xbf16>
    %2 = arith.extf %1 : vector<2x4x4x16xbf16> to vector<2x4x4x16xf32>
    %c0_4 = arith.constant 0 : index
    %c0_5 = arith.constant 0 : index
    %c0_6 = arith.constant 0 : index
    %c0_7 = arith.constant 0 : index
    %c0_8 = arith.constant 0 : index
    %3 = vector.load %arg2[%c0_4, %c0_5, %c0_6, %c0_7, %c0_8] : memref<2x4x4x4x16xbf16, #tpu.memory_space<vmem>>, vector<2x1x4x4x16xbf16>
    %4 = vector.shape_cast %3 : vector<2x1x4x4x16xbf16> to vector<2x4x4x16xbf16>
    %5 = arith.extf %4 : vector<2x4x4x16xbf16> to vector<2x4x4x16xf32>
    %6 = arith.subf %2, %5 : vector<2x4x4x16xf32>
    %7 = arith.mulf %6, %6 : vector<2x4x4x16xf32>
    %cst = arith.constant dense<0.000000e+00> : vector<2x4x16xf32>
    %8 = vector.multi_reduction <add>, %7, %cst [2] : vector<2x4x4x16xf32> to vector<2x4x16xf32>
    %c0_9 = arith.constant 0 : index
    %c1 = arith.constant 1 : index
    %c0_10 = arith.constant 0 : index
    %c0_11 = arith.constant 0 : index
    %c0_12 = arith.constant 0 : index
    %9 = vector.load %arg1[%c0_9, %c1, %c0_10, %c0_11, %c0_12] : memref<2x4x4x4x16xbf16, #tpu.memory_space<vmem>>, vector<2x1x4x4x16xbf16>
    %10 = vector.shape_cast %9 : vector<2x1x4x4x16xbf16> to vector<2x4x4x16xbf16>
    %11 = arith.extf %10 : vector<2x4x4x16xbf16> to vector<2x4x4x16xf32>
    %c0_13 = arith.constant 0 : index
    %c1_14 = arith.constant 1 : index
    %c0_15 = arith.constant 0 : index
    %c0_16 = arith.constant 0 : index
    %c0_17 = arith.constant 0 : index
    %12 = vector.load %arg2[%c0_13, %c1_14, %c0_15, %c0_16, %c0_17] : memref<2x4x4x4x16xbf16, #tpu.memory_space<vmem>>, vector<2x1x4x4x16xbf16>
    %13 = vector.shape_cast %12 : vector<2x1x4x4x16xbf16> to vector<2x4x4x16xbf16>
    %14 = arith.extf %13 : vector<2x4x4x16xbf16> to vector<2x4x4x16xf32>
    %15 = arith.subf %11, %14 : vector<2x4x4x16xf32>
    %16 = arith.mulf %15, %15 : vector<2x4x4x16xf32>
    %cst_18 = arith.constant dense<0.000000e+00> : vector<2x4x16xf32>
    %17 = vector.multi_reduction <add>, %16, %cst_18 [2] : vector<2x4x4x16xf32> to vector<2x4x16xf32>
    %18 = arith.addf %8, %17 : vector<2x4x16xf32>
    %c0_19 = arith.constant 0 : index
    %c2 = arith.constant 2 : index
    %c0_20 = arith.constant 0 : index
    %c0_21 = arith.constant 0 : index
    %c0_22 = arith.constant 0 : index
    %19 = vector.load %arg1[%c0_19, %c2, %c0_20, %c0_21, %c0_22] : memref<2x4x4x4x16xbf16, #tpu.memory_space<vmem>>, vector<2x1x4x4x16xbf16>
    %20 = vector.shape_cast %19 : vector<2x1x4x4x16xbf16> to vector<2x4x4x16xbf16>
    %21 = arith.extf %20 : vector<2x4x4x16xbf16> to vector<2x4x4x16xf32>
    %c0_23 = arith.constant 0 : index
    %c2_24 = arith.constant 2 : index
    %c0_25 = arith.constant 0 : index
    %c0_26 = arith.constant 0 : index
    %c0_27 = arith.constant 0 : index
    %22 = vector.load %arg2[%c0_23, %c2_24, %c0_25, %c0_26, %c0_27] : memref<2x4x4x4x16xbf16, #tpu.memory_space<vmem>>, vector<2x1x4x4x16xbf16>
    %23 = vector.shape_cast %22 : vector<2x1x4x4x16xbf16> to vector<2x4x4x16xbf16>
    %24 = arith.extf %23 : vector<2x4x4x16xbf16> to vector<2x4x4x16xf32>
    %25 = arith.subf %21, %24 : vector<2x4x4x16xf32>
    %26 = arith.mulf %25, %25 : vector<2x4x4x16xf32>
    %cst_28 = arith.constant dense<0.000000e+00> : vector<2x4x16xf32>
    %27 = vector.multi_reduction <add>, %26, %cst_28 [2] : vector<2x4x4x16xf32> to vector<2x4x16xf32>
    %28 = arith.addf %18, %27 : vector<2x4x16xf32>
    %c0_29 = arith.constant 0 : index
    %c3 = arith.constant 3 : index
    %c0_30 = arith.constant 0 : index
    %c0_31 = arith.constant 0 : index
    %c0_32 = arith.constant 0 : index
    %29 = vector.load %arg1[%c0_29, %c3, %c0_30, %c0_31, %c0_32] : memref<2x4x4x4x16xbf16, #tpu.memory_space<vmem>>, vector<2x1x4x4x16xbf16>
    %30 = vector.shape_cast %29 : vector<2x1x4x4x16xbf16> to vector<2x4x4x16xbf16>
    %31 = arith.extf %30 : vector<2x4x4x16xbf16> to vector<2x4x4x16xf32>
    %c0_33 = arith.constant 0 : index
    %c3_34 = arith.constant 3 : index
    %c0_35 = arith.constant 0 : index
    %c0_36 = arith.constant 0 : index
    %c0_37 = arith.constant 0 : index
    %32 = vector.load %arg2[%c0_33, %c3_34, %c0_35, %c0_36, %c0_37] : memref<2x4x4x4x16xbf16, #tpu.memory_space<vmem>>, vector<2x1x4x4x16xbf16>
    %33 = vector.shape_cast %32 : vector<2x1x4x4x16xbf16> to vector<2x4x4x16xbf16>
    %34 = arith.extf %33 : vector<2x4x4x16xbf16> to vector<2x4x4x16xf32>
    %35 = arith.subf %31, %34 : vector<2x4x4x16xf32>
    %36 = arith.mulf %35, %35 : vector<2x4x4x16xf32>
    %cst_38 = arith.constant dense<0.000000e+00> : vector<2x4x16xf32>
    %37 = vector.multi_reduction <add>, %36, %cst_38 [2] : vector<2x4x4x16xf32> to vector<2x4x16xf32>
    %38 = arith.addf %28, %37 : vector<2x4x16xf32>
    %c0_39 = arith.constant 0 : index
    %c0_40 = arith.constant 0 : index
    %c0_41 = arith.constant 0 : index
    %39 = vector.load %arg3[%c0_39, %c0_40, %c0_41] : memref<2x4x16xf32, #tpu.memory_space<vmem>>, vector<2x4x16xf32>
    %40 = arith.mulf %38, %39 : vector<2x4x16xf32>
    %cst_42 = arith.constant dense<0.000000e+00> : vector<2x4xf32>
    %41 = vector.multi_reduction <add>, %40, %cst_42 [2] : vector<2x4x16xf32> to vector<2x4xf32>
    %42 = vector.shape_cast %41 : vector<2x4xf32> to vector<2x4x1xf32>
    %cst_43 = arith.constant dense<0.000000e+00> : vector<2x1xf32>
    %43 = vector.multi_reduction <add>, %42, %cst_43 [1] : vector<2x4x1xf32> to vector<2x1xf32>
    %44 = vector.shape_cast %43 : vector<2x1xf32> to vector<2x1x1xf32>
    %cst_44 = arith.constant 2.500000e-01 : f32
    %45 = vector.broadcast %cst_44 : f32 to vector<2x1x1xf32>
    %46 = arith.mulf %44, %45 : vector<2x1x1xf32>
    %c0_45 = arith.constant 0 : index
    %c0_46 = arith.constant 0 : index
    %c0_47 = arith.constant 0 : index
    %47 = vector.load %arg4[%c0_45, %c0_46, %c0_47] : memref<2x1x1xf32, #tpu.memory_space<vmem>>, vector<2x1x1xf32>
    tpu.vector_store %arg4[%c0_45, %c0_46, %c0_47], %46 {strides = array<i32>} : memref<2x1x1xf32, #tpu.memory_space<vmem>>, vector<2x1x1xf32>,
    return
  }
  func.func @transform_0(%arg0: i32) -> (i32, i32, i32, i32, i32) {
    %c0_i32 = arith.constant 0 : i32
    %c0_i32_0 = arith.constant 0 : i32
    %c0_i32_1 = arith.constant 0 : i32
    %c0_i32_2 = arith.constant 0 : i32
    %c0_i32_3 = arith.constant 0 : i32
    return %arg0, %c0_i32, %c0_i32_0, %c0_i32_1, %c0_i32_2 : i32, i32, i32, i32, i32
  }
  func.func @transform_1(%arg0: i32) -> (i32, i32, i32, i32, i32) {
    %c0_i32 = arith.constant 0 : i32
    %c0_i32_0 = arith.constant 0 : i32
    %c0_i32_1 = arith.constant 0 : i32
    %c0_i32_2 = arith.constant 0 : i32
    %c0_i32_3 = arith.constant 0 : i32
    return %arg0, %c0_i32, %c0_i32_0, %c0_i32_1, %c0_i32_2 : i32, i32, i32, i32, i32
  }
  func.func @transform_2(%arg0: i32) -> (i32, i32, i32) {
    %c0_i32 = arith.constant 0 : i32
    %c0_i32_0 = arith.constant 0 : i32
    %c0_i32_1 = arith.constant 0 : i32
    return %arg0, %c0_i32, %c0_i32_0 : i32, i32, i32
  }
  func.func @transform_3(%arg0: i32) -> (i32, i32, i32) {
    %c0_i32 = arith.constant 0 : i32
    %c0_i32_0 = arith.constant 0 : i32
    %c0_i32_1 = arith.constant 0 : i32
    return %arg0, %c0_i32, %c0_i32_0 : i32, i32, i32
  }
}

</mosaic_0001>

<bundles_post_ra>
// kernel: tpu_custom_call.1
= control target key start
LH: loop header
LB: loop body
LE: loop exit
PB: predicated region body
PF: predicated region fallthrough
CT: control target
= control target key end

     0   :  { %8 = vsyncpa [#allocation3], 0  ;;  %s802_s0 = inlined_call_operand.hbm [shape: bf16[2,4,4,4,16], index: 0, kind: input, shape index: {}]   ;;  %s803_s1 = inlined_call_operand.hbm [shape: bf16[2,4,4,4,16], index: 1, kind: input, shape index: {}]   ;;  %s804_s2 = inlined_call_operand.hbm [shape: f32[2,4,16], index: 2, kind: input, shape index: {}]   ;;  %s805_s3 = inlined_call_operand.vmem [shape: f32[2,1,1], index: 3, kind: output, shape index: {}]  }
   0x1   :  { %9 = vsyncpa [#allocation5], 0  ;;  %s662_s12 = smov [#allocation4]   ;;  %s663_s14 = smov [#allocation2]  }
   0x2   :  { %s27_s13 = sshll.u32 %s662_s12, 4  ;;  %s15_s15 = sshll.u32 %s663_s14, 4  ;;  %s28_s13 = int_to_ptr.vmem [resolvable:$true] %s27_s13  ;;  %s689_s15 = int_to_ptr.vmem [resolvable:$true] %s15_s15 }
   0x3   :  { %s592_s18 = scalar_lea.hbm %s803_s1, 1024 }
   0x4   :  { %p593_p0 = scmp.ne.s32.totalorder %s803_s1, %s592_s18  ;;  %p596_p1 = scmp.lt.u32.totalorder %s592_s18, %s803_s1 }
   0x6   :  { %p598_p2 = pnand %p596_p1, %p593_p0 }
   0x8   :  { %601 = shalt.err (!%p598_p2)
}
   0x9   :  { %s602_s23 = scalar_lea.vmem %s28_s13, 1024  ;;  %p607_p4 = scmp.lt.s32.totalorder %s28_s13, %s28_s13 }
   0xa   :  { %p603_p3 = scmp.ne.s32.totalorder %s28_s13, %s602_s23  ;;  %p608_p5 = scmp.lt.s32.totalorder %s602_s23, %s602_s23 }
   0xc   :  { %p609_p6 = por %p608_p5, %p607_p4 }
   0xe   :  { %p610_p7 = pnand %p609_p6, %p603_p3 }
  0x10   :  { %613 = shalt.err (!%p610_p7)
}
  0x11   :  { %s664_s24 = smov 32   ;;  %s665_s25 = smov 2  }
  0x12   :  { %33 = dma.hbm_to_vmem [thread:$0]  %s803_s1, 1024, %s28_s13, [#allocation5], %s664_s24, %s664_s24, %s665_s25  }
  0x13   :  { %s614_s30 = scalar_lea.hbm %s802_s0, 1024 }
  0x14   :  { %p615_p8 = scmp.ne.s32.totalorder %s802_s0, %s614_s30  ;;  %p618_p9 = scmp.lt.u32.totalorder %s614_s30, %s802_s0 }
  0x16   :  { %p620_p10 = pnand %p618_p9, %p615_p8 }
  0x18   :  { %623 = shalt.err (!%p620_p10)
}
  0x19   :  { %s624_s8 = scalar_lea.vmem %s689_s15, 1024  ;;  %p629_p12 = scmp.lt.s32.totalorder %s689_s15, %s689_s15 }
  0x1a   :  { %p625_p11 = scmp.ne.s32.totalorder %s689_s15, %s624_s8  ;;  %p630_p13 = scmp.lt.s32.totalorder %s624_s8, %s624_s8 }
  0x1c   :  { %p631_p0 = por %p630_p13, %p629_p12 }
  0x1e   :  { %p632_p1 = pnand %p631_p0, %p625_p11 }
  0x20   :  { %635 = shalt.err (!%p632_p1)
}
  0x21   :  { %21 = dma.hbm_to_vmem [thread:$0]  %s802_s0, 1024, %s689_s15, [#allocation3], %s664_s24, %s664_s24, %s665_s25  }
  0x22   :  { %s666_s10 = smov [#allocation6]   ;;  %s636_s14 = scalar_lea.hbm %s804_s2, 128 }
  0x23   :  { %s39_s11 = sshll.u32 %s666_s10, 4  ;;  %p637_p2 = scmp.ne.s32.totalorder %s804_s2, %s636_s14  ;;  %s40_s11 = int_to_ptr.vmem [resolvable:$true] %s39_s11 }
  0x24   :  { %p640_p3 = scmp.lt.u32.totalorder %s636_s14, %s804_s2 }
  0x26   :  { %p642_p4 = pnand %p640_p3, %p637_p2 }
  0x28   :  { %645 = shalt.err (!%p642_p4)
}
  0x29   :  { %s646_s20 = scalar_lea.vmem %s40_s11, 128  ;;  %p651_p6 = scmp.lt.s32.totalorder %s40_s11, %s40_s11 }
  0x2a   :  { %p647_p5 = scmp.ne.s32.totalorder %s40_s11, %s646_s20  ;;  %p652_p7 = scmp.lt.s32.totalorder %s646_s20, %s646_s20 }
  0x2c   :  { %p653_p8 = por %p652_p7, %p651_p6 }
  0x2e   :  { %p654_p9 = pnand %p653_p8, %p647_p5 }
  0x30   :  { %657 = shalt.err (!%p654_p9)
}
  0x31   :  { %s667_s0 = smov 64   ;;  %s668_s15 = smov 4  }
  0x32   :  { %45 = dma.hbm_to_vmem [thread:$0]  %s804_s2, 128, %s40_s11, [#allocation5], %s667_s0, %s667_s0, %s668_s15  }
  0x33   :  { %658 = dma.done.wait [#allocation3], 1024  }
  0x34   :  { %659 = vsyncadd [#allocation3], 4294966272 }
  0x35   :  { %660 = dma.done.wait [#allocation5], 1152  }
  0x36   :  { %661 = vsyncadd [#allocation5], 4294966144  ;;  %vm103_vm0 = vcmask 125952   ;;  %v55_v0 = vld [vmem:[#allocation2] sm:$0x3]  ;;  %vm537_vm1 = vcmask 1041409  }
  0x37   :  { %v56_v1 = vld [vmem:[#allocation2 + $0x2] sm:$0x3]  ;;  %v57_v2 = vld [vmem:[#allocation2 + $0x4] sm:$0x3]  ;;  %v58_v3 = vld [vmem:[#allocation2 + $0x6] sm:$0x3]  ;;  %v63_v4 = vunpack.c.l.bf16 %v55_v0 }
  0x38   :  { %v64_v5 = vunpack.c.l.bf16 %v56_v1  ;;  %v65_v6 = vunpack.c.l.bf16 %v57_v2  ;;  %v71_v7 = vld [vmem:[#allocation4] sm:$0x3]  ;;  %v72_v8 = vld [vmem:[#allocation4 + $0x2] sm:$0x3]  ;;  %v66_v9 = vunpack.c.l.bf16 %v58_v3  ;;  %v73_v10 = vld [vmem:[#allocation4 + $0x4] sm:$0x3] }
  0x39   :  { %v74_v11 = vld [vmem:[#allocation4 + $0x6] sm:$0x3]  ;;  %v79_v12 = vunpack.c.l.bf16 %v71_v7  ;;  %v80_v13 = vunpack.c.l.bf16 %v72_v8  ;;  %v161_v14 = vld [vmem:[#allocation2 + $0x8] sm:$0x3]  ;;  %v81_v15 = vunpack.c.l.bf16 %v73_v10  ;;  %v162_v17 = vld [vmem:[#allocation2 + $0xa] sm:$0x3] }
  0x3a   :  { %v82_v16 = vunpack.c.l.bf16 %v74_v11  ;;  %v163_v18 = vld [vmem:[#allocation2 + $0xc] sm:$0x3]  ;;  %v164_v19 = vld [vmem:[#allocation2 + $0xe] sm:$0x3]  ;;  %v169_v20 = vunpack.c.l.bf16 %v161_v14  ;;  %v170_v23 = vunpack.c.l.bf16 %v162_v17  ;;  %v178_v25 = vld [vmem:[#allocation4 + $0x8] sm:$0x3] }
  0x3b   :  { %v87_v21 = vsub.f32 %v63_v4, %v79_v12  ;;  %v88_v22 = vsub.f32 %v64_v5, %v80_v13  ;;  %v171_v24 = vunpack.c.l.bf16 %v163_v18  ;;  %v179_v26 = vld [vmem:[#allocation4 + $0xa] sm:$0x3]  ;;  %v180_v27 = vld [vmem:[#allocation4 + $0xc] sm:$0x3]  ;;  %v89_v28 = vsub.f32 %v65_v6, %v81_v15  ;;  %v181_v31 = vld [vmem:[#allocation4 + $0xe] sm:$0x3] }
  0x3c   :  { %v90_v29 = vsub.f32 %v66_v9, %v82_v16  ;;  %v172_v30 = vunpack.c.l.bf16 %v164_v19  ;;  %v186_v32 = vunpack.c.l.bf16 %v178_v25  ;;  %v187_v35 = vunpack.c.l.bf16 %v179_v26  ;;  %v275_v17 = vld [vmem:[#allocation2 + $0x10] sm:$0x3] }
  0x3d   :  { %v95_v33 = vmul.f32 %v87_v21, %v87_v21  ;;  %v96_v34 = vmul.f32 %v88_v22, %v88_v22  ;;  %v188_v36 = vunpack.c.l.bf16 %v180_v27  ;;  %v97_v37 = vmul.f32 %v89_v28, %v89_v28  ;;  %v276_v22 = vld [vmem:[#allocation2 + $0x12] sm:$0x3]  ;;  %v277_v27 = vld [vmem:[#allocation2 + $0x14] sm:$0x3]  ;;  %v278_v28 = vld [vmem:[#allocation2 + $0x16] sm:$0x3] }
  0x3e   :  { %v98_v38 = vmul.f32 %v90_v29, %v90_v29  ;;  %v189_v39 = vunpack.c.l.bf16 %v181_v31  ;;  %v194_v40 = vsub.f32 %v169_v20, %v186_v32  ;;  %v195_v43 = vsub.f32 %v170_v23, %v187_v35 }
  0x3f   :  { %v104_v41 = vsel %vm103_vm0, %v95_v33, 0.0  ;;  %v111_v42 = vsel %vm103_vm0, %v96_v34, 0.0  ;;  %v196_v44 = vsub.f32 %v171_v24, %v188_v36  ;;  %v118_v47 = vsel %vm103_vm0, %v97_v37, 0.0  ;;  %v292_v33 = vld [vmem:[#allocation4 + $0x10] sm:$0x3] }
  0x40   :  { %v105_v45 = vrot.slane %v104_v41, 4  ;;  %v112_v46 = vrot.slane %v111_v42, 4  ;;  %v125_v48 = vsel %vm103_vm0, %v98_v38, 0.0  ;;  %v119_v49 = vrot.slane %v118_v47, 4  ;;  %v293_v34 = vld [vmem:[#allocation4 + $0x12] sm:$0x3] }
  0x41   :  { %v126_v50 = vrot.slane %v125_v48, 4  ;;  %v197_v51 = vsub.f32 %v172_v30, %v189_v39  ;;  %v202_v52 = vmul.f32 %v194_v40, %v194_v40  ;;  %v203_v55 = vmul.f32 %v195_v43, %v195_v43  ;;  %v294_v39 = vld [vmem:[#allocation4 + $0x14] sm:$0x3]  ;;  %v295_v40 = vld [vmem:[#allocation4 + $0x16] sm:$0x3] }
  0x42   :  { %v106_v53 = vadd.f32 %v105_v45, %v104_v41  ;;  %v113_v54 = vadd.f32 %v112_v46, %v111_v42  ;;  %v204_v56 = vmul.f32 %v196_v44, %v196_v44  ;;  %v120_v57 = vadd.f32 %v119_v49, %v118_v47 }
  0x43   :  { %v127_v58 = vadd.f32 %v126_v50, %v125_v48  ;;  %v205_v59 = vmul.f32 %v197_v51, %v197_v51  ;;  %v210_v60 = vsel %vm103_vm0, %v202_v52, 0.0  ;;  %v217_v0 = vsel %vm103_vm0, %v203_v55, 0.0 }
  0x44   :  { %v107_v61 = vrot.slane %v106_v53, 2  ;;  %v114_v62 = vrot.slane %v113_v54, 2  ;;  %v211_v63 = vrot.slane %v210_v60, 4  ;;  %v121_v1 = vrot.slane %v120_v57, 2 }
  0x45   :  { %v128_v2 = vrot.slane %v127_v58, 2  ;;  %v218_v3 = vrot.slane %v217_v0, 4  ;;  %v224_v4 = vsel %vm103_vm0, %v204_v56, 0.0  ;;  %v231_v12 = vsel %vm103_vm0, %v205_v59, 0.0 }
  0x46   :  { %v108_v5 = vadd.f32 %v107_v61, %v106_v53  ;;  %v115_v6 = vadd.f32 %v114_v62, %v113_v54  ;;  %v212_v7 = vadd.f32 %v211_v63, %v210_v60  ;;  %v225_v8 = vrot.slane %v224_v4, 4  ;;  %v389_v53 = vld [vmem:[#allocation2 + $0x18] sm:$0x3]  ;;  %v391_v63 = vld [vmem:[#allocation2 + $0x1c] sm:$0x3] }
  0x47   :  { %v122_v9 = vadd.f32 %v121_v1, %v120_v57  ;;  %v129_v10 = vadd.f32 %v128_v2, %v127_v58  ;;  %v219_v11 = vadd.f32 %v218_v3, %v217_v0  ;;  %v232_v21 = vrot.slane %v231_v12, 4  ;;  %v390_v58 = vld [vmem:[#allocation2 + $0x1a] sm:$0x3]  ;;  %v392_v0 = vld [vmem:[#allocation2 + $0x1e] sm:$0x3] }
  0x48   :  { %v109_v13 = vrot.slane %v108_v5, 1  ;;  %v116_v14 = vrot.slane %v115_v6, 1  ;;  %v213_v15 = vrot.slane %v212_v7, 2  ;;  %v226_v16 = vadd.f32 %v225_v8, %v224_v4 }
  0x49   :  { %v123_v18 = vrot.slane %v122_v9, 1  ;;  %v130_v19 = vrot.slane %v129_v10, 1  ;;  %v220_v20 = vrot.slane %v219_v11, 2  ;;  %v233_v32 = vadd.f32 %v232_v21, %v231_v12 }
  0x4a   :  { %v110_v23 = vadd.f32 %v109_v13, %v108_v5  ;;  %v117_v24 = vadd.f32 %v116_v14, %v115_v6  ;;  %v214_v25 = vadd.f32 %v213_v15, %v212_v7  ;;  %v227_v26 = vrot.slane %v226_v16, 2  ;;  %v408_v15 = vld [vmem:[#allocation4 + $0x1c] sm:$0x3] }
  0x4b   :  { %v124_v29 = vadd.f32 %v123_v18, %v122_v9  ;;  %v131_v30 = vadd.f32 %v130_v19, %v129_v10  ;;  %v221_v31 = vadd.f32 %v220_v20, %v219_v11  ;;  %v283_v37 = vunpack.c.l.bf16 %v275_v17  ;;  %v406_v9 = vld [vmem:[#allocation4 + $0x18] sm:$0x3]  ;;  %v407_v10 = vld [vmem:[#allocation4 + $0x1a] sm:$0x3]  ;;  %v409_v20 = vld [vmem:[#allocation4 + $0x1e] sm:$0x3] }
  0x4c   :  { %v215_v35 = vrot.slane %v214_v25, 1  ;;  %v228_v36 = vadd.f32 %v227_v26, %v226_v16  ;;  %v284_v38 = vunpack.c.l.bf16 %v276_v22  ;;  %v234_v42 = vrot.slane %v233_v32, 2 }
  0x4d   :  { %v222_v41 = vrot.slane %v221_v31, 1  ;;  %v285_v43 = vunpack.c.l.bf16 %v277_v27  ;;  %v286_v44 = vunpack.c.l.bf16 %v278_v28  ;;  %v300_v47 = vunpack.c.l.bf16 %v292_v33 }
  0x4e   :  { %v216_v45 = vadd.f32 %v215_v35, %v214_v25  ;;  %v229_v46 = vrot.slane %v228_v36, 1  ;;  %v301_v48 = vunpack.c.l.bf16 %v293_v34  ;;  %v235_v50 = vadd.f32 %v234_v42, %v233_v32 }
  0x4f   :  { %v223_v49 = vadd.f32 %v222_v41, %v221_v31  ;;  %v302_v51 = vunpack.c.l.bf16 %v294_v39  ;;  %v303_v52 = vunpack.c.l.bf16 %v295_v40  ;;  %v308_v56 = vsub.f32 %v283_v37, %v300_v47 }
  0x50   :  { %v230_v54 = vadd.f32 %v229_v46, %v228_v36  ;;  %v740_v55 = vadd.f32 %v216_v45, %v110_v23  ;;  %v309_v57 = vsub.f32 %v284_v38, %v301_v48  ;;  %v236_v59 = vrot.slane %v235_v50, 1 }
  0x51   :  { %v742_v60 = vadd.f32 %v223_v49, %v117_v24  ;;  %v310_v61 = vsub.f32 %v285_v43, %v302_v51  ;;  %v311_v62 = vsub.f32 %v286_v44, %v303_v52  ;;  %v316_v2 = vmul.f32 %v308_v56, %v308_v56 }
  0x52   :  { %v744_v1 = vadd.f32 %v230_v54, %v124_v29  ;;  %v317_v3 = vmul.f32 %v309_v57, %v309_v57  ;;  %v397_v4 = vunpack.c.l.bf16 %v389_v53  ;;  %v237_v5 = vadd.f32 %v236_v59, %v235_v50 }
  0x53   :  { %v318_v6 = vmul.f32 %v310_v61, %v310_v61  ;;  %v319_v7 = vmul.f32 %v311_v62, %v311_v62  ;;  %v398_v8 = vunpack.c.l.bf16 %v390_v58  ;;  %v324_v11 = vsel %vm103_vm0, %v316_v2, 0.0 }
  0x54   :  { %v331_v12 = vsel %vm103_vm0, %v317_v3, 0.0  ;;  %v399_v13 = vunpack.c.l.bf16 %v391_v63  ;;  %v400_v14 = vunpack.c.l.bf16 %v392_v0  ;;  %v269_v16 = vadd.f32 %v237_v5, %v131_v30 }
  0x55   :  { %v325_v17 = vrot.slane %v324_v11, 4  ;;  %v332_v18 = vrot.slane %v331_v12, 4  ;;  %v338_v19 = vsel %vm103_vm0, %v318_v6, 0.0  ;;  %v345_v22 = vsel %vm103_vm0, %v319_v7, 0.0 }
  0x56   :  { %v339_v21 = vrot.slane %v338_v19, 4  ;;  %v414_v23 = vunpack.c.l.bf16 %v406_v9  ;;  %v415_v24 = vunpack.c.l.bf16 %v407_v10  ;;  %v346_v27 = vrot.slane %v345_v22, 4  ;;  %v59_v9 = vld [vmem:[#allocation2 + $0x20] sm:$0x3]  ;;  %v60_v10 = vld [vmem:[#allocation2 + $0x22] sm:$0x3] }
  0x57   :  { %v326_v25 = vadd.f32 %v325_v17, %v324_v11  ;;  %v333_v26 = vadd.f32 %v332_v18, %v331_v12  ;;  %v416_v28 = vunpack.c.l.bf16 %v408_v15  ;;  %v417_v31 = vunpack.c.l.bf16 %v409_v20  ;;  %v61_v15 = vld [vmem:[#allocation2 + $0x24] sm:$0x3]  ;;  %v62_v17 = vld [vmem:[#allocation2 + $0x26] sm:$0x3] }
  0x58   :  { %v340_v29 = vadd.f32 %v339_v21, %v338_v19  ;;  %v422_v32 = vsub.f32 %v397_v4, %v414_v23  ;;  %v423_v33 = vsub.f32 %v398_v8, %v415_v24  ;;  %v347_v35 = vadd.f32 %v346_v27, %v345_v22  ;;  %v754_v4 = vld [vmem:[#allocation6] sm:$0xf] }
  0x59   :  { %v327_v34 = vrot.slane %v326_v25, 2  ;;  %v334_v30 = vrot.slane %v333_v26, 2  ;;  %v424_v36 = vsub.f32 %v399_v13, %v416_v28  ;;  %v425_v38 = vsub.f32 %v400_v14, %v417_v31  ;;  %v75_v22 = vld [vmem:[#allocation4 + $0x20] sm:$0x3]  ;;  %v78_v31 = vld [vmem:[#allocation4 + $0x26] sm:$0x3] }
  0x5a   :  { %v341_v37 = vrot.slane %v340_v29, 2  ;;  %v430_v39 = vmul.f32 %v422_v32, %v422_v32  ;;  %v431_v40 = vmul.f32 %v423_v33, %v423_v33  ;;  %v348_v43 = vrot.slane %v347_v35, 2 }
  0x5b   :  { %v328_v41 = vadd.f32 %v327_v34, %v326_v25  ;;  %v335_v42 = vadd.f32 %v334_v30, %v333_v26  ;;  %v432_v44 = vmul.f32 %v424_v36, %v424_v36  ;;  %v433_v46 = vmul.f32 %v425_v38, %v425_v38  ;;  %v77_v26 = vld [vmem:[#allocation4 + $0x24] sm:$0x3] }
  0x5c   :  { %v342_v45 = vadd.f32 %v341_v37, %v340_v29  ;;  %v438_v47 = vsel %vm103_vm0, %v430_v39, 0.0  ;;  %v445_v48 = vsel %vm103_vm0, %v431_v40, 0.0  ;;  %v349_v51 = vadd.f32 %v348_v43, %v347_v35 }
  0x5d   :  { %v329_v49 = vrot.slane %v328_v41, 1  ;;  %v336_v50 = vrot.slane %v335_v42, 1  ;;  %v439_v52 = vrot.slane %v438_v47, 4  ;;  %v446_v54 = vrot.slane %v445_v48, 4 }
  0x5e   :  { %v343_v53 = vrot.slane %v342_v45, 1  ;;  %v452_v56 = vsel %vm103_vm0, %v432_v44, 0.0  ;;  %v459_v57 = vsel %vm103_vm0, %v433_v46, 0.0  ;;  %v350_v61 = vrot.slane %v349_v51, 1 }
  0x5f   :  { %v330_v58 = vadd.f32 %v329_v49, %v328_v41  ;;  %v337_v59 = vadd.f32 %v336_v50, %v335_v42  ;;  %v440_v62 = vadd.f32 %v439_v52, %v438_v47  ;;  %v447_v0 = vadd.f32 %v446_v54, %v445_v48 }
  0x60   :  { %v344_v63 = vadd.f32 %v343_v53, %v342_v45  ;;  %v453_v2 = vrot.slane %v452_v56, 4  ;;  %v460_v3 = vrot.slane %v459_v57, 4  ;;  %v351_v5 = vadd.f32 %v350_v61, %v349_v51 }
  0x61   :  { %v380_v6 = vadd.f32 %v330_v58, %v740_v55  ;;  %v381_v7 = vadd.f32 %v337_v59, %v742_v60  ;;  %v441_v8 = vrot.slane %v440_v62, 2  ;;  %v448_v12 = vrot.slane %v447_v0, 2  ;;  %v76_v55 = vld [vmem:[#allocation4 + $0x22] sm:$0x3] }
  0x62   :  { %v382_v11 = vadd.f32 %v344_v63, %v744_v1  ;;  %v454_v13 = vadd.f32 %v453_v2, %v452_v56  ;;  %v461_v14 = vadd.f32 %v460_v3, %v459_v57  ;;  %v383_v18 = vadd.f32 %v351_v5, %v269_v16  ;;  %v165_v2 = vld [vmem:[#allocation2 + $0x28] sm:$0x3]  ;;  %v166_v3 = vld [vmem:[#allocation2 + $0x2a] sm:$0x3]  ;;  %v168_v5 = vld [vmem:[#allocation2 + $0x2e] sm:$0x3] }
  0x63   :  { %v442_v19 = vadd.f32 %v441_v8, %v440_v62  ;;  %v506_v20 = vrot.slane %v754_v4, 1  ;;  %v507_v21 = vrot.slane %v754_v4, 2  ;;  %v449_v23 = vadd.f32 %v448_v12, %v447_v0 }
  0x64   :  { %v455_v60 = vrot.slane %v454_v13, 2  ;;  %v462_v24 = vrot.slane %v461_v14, 2  ;;  %v508_v25 = vrot.slane %v754_v4, 3  ;;  %v67_v27 = vunpack.c.l.bf16 %v59_v9 }
  0x65   :  { %v443_v1 = vrot.slane %v442_v19, 1  ;;  %v68_v28 = vunpack.c.l.bf16 %v60_v10  ;;  %v69_v29 = vunpack.c.l.bf16 %v61_v15  ;;  %v450_v32 = vrot.slane %v449_v23, 1 }
  0x66   :  { %v456_v16 = vadd.f32 %v455_v60, %v454_v13  ;;  %v463_v33 = vadd.f32 %v462_v24, %v461_v14  ;;  %v70_v34 = vunpack.c.l.bf16 %v62_v17  ;;  %v83_v35 = vunpack.c.l.bf16 %v75_v22  ;;  %v184_v17 = vld [vmem:[#allocation4 + $0x2c] sm:$0x3] }
  0x67   :  { %v444_v30 = vadd.f32 %v443_v1, %v442_v19  ;;  %v84_v36 = vunpack.c.l.bf16 %v76_v55  ;;  %v85_v37 = vunpack.c.l.bf16 %v77_v26  ;;  %v451_v38 = vadd.f32 %v450_v32, %v449_v23 }
  0x68   :  { %v457_v39 = vrot.slane %v456_v16, 1  ;;  %v464_v40 = vrot.slane %v463_v33, 1  ;;  %v86_v41 = vunpack.c.l.bf16 %v78_v31  ;;  %v91_v43 = vsub.f32 %v67_v27, %v83_v35 }
  0x69   :  { %v494_v42 = vadd.f32 %v444_v30, %v380_v6  ;;  %v92_v44 = vsub.f32 %v68_v28, %v84_v36  ;;  %v93_v45 = vsub.f32 %v69_v29, %v85_v37  ;;  %v495_v48 = vadd.f32 %v451_v38, %v381_v7  ;;  %v182_v6 = vld [vmem:[#allocation4 + $0x28] sm:$0x3]  ;;  %v279_v30 = vld [vmem:[#allocation2 + $0x30] sm:$0x3]  ;;  %v280_v38 = vld [vmem:[#allocation2 + $0x32] sm:$0x3] }
  0x6a   :  { %v458_v46 = vadd.f32 %v457_v39, %v456_v16  ;;  %v465_v47 = vadd.f32 %v464_v40, %v463_v33  ;;  %v94_v49 = vsub.f32 %v70_v34, %v86_v41  ;;  %v99_v51 = vmul.f32 %v91_v43, %v91_v43  ;;  %v281_v39 = vld [vmem:[#allocation2 + $0x34] sm:$0x3]  ;;  %v282_v40 = vld [vmem:[#allocation2 + $0x36] sm:$0x3] }
  0x6b   :  { %v520_v50 = vmul.f32 %v754_v4, %v494_v42  ;;  %v100_v52 = vmul.f32 %v92_v44, %v92_v44  ;;  %v521_v56 = vmul.f32 %v506_v20, %v495_v48  ;;  %v101_v57 = vmul.f32 %v93_v45, %v93_v45  ;;  %v167_v4 = vld [vmem:[#allocation2 + $0x2c] sm:$0x3]  ;;  %v296_v45 = vld [vmem:[#allocation4 + $0x30] sm:$0x3] }
  0x6c   :  { %v496_v53 = vadd.f32 %v458_v46, %v382_v11  ;;  %v497_v54 = vadd.f32 %v465_v47, %v383_v18  ;;  %vm540_vm2 = vcmask 1042434   ;;  %vm543_vm3 = vcmask 1043459   ;;  %v183_v11 = vld [vmem:[#allocation4 + $0x2a] sm:$0x3]  ;;  %v297_v46 = vld [vmem:[#allocation4 + $0x32] sm:$0x3] }
  0x6d   :  { %v102_v58 = vmul.f32 %v94_v49, %v94_v49  ;;  %v132_v59 = vsel %vm103_vm0, %v99_v51, 0.0  ;;  %v536_v63 = vrot.slane %v521_v56, 7  ;;  %v139_v0 = vsel %vm103_vm0, %v100_v52, 0.0  ;;  %v299_v56 = vld [vmem:[#allocation4 + $0x36] sm:$0x3] }
  0x6e   :  { %v522_v61 = vmul.f32 %v507_v21, %v496_v53  ;;  %v523_v62 = vmul.f32 %v508_v25, %v497_v54  ;;  %v146_v10 = vsel %vm103_vm0, %v101_v57, 0.0  ;;  %v133_v12 = vrot.slane %v132_v59, 4  ;;  %v185_v21 = vld [vmem:[#allocation4 + $0x2e] sm:$0x3] }
  0x6f   :  { %v538_v7 = vsel %vm537_vm1, %v536_v63, %v520_v50  ;;  %v140_v13 = vrot.slane %v139_v0, 4  ;;  %v153_v14 = vsel %vm103_vm0, %v102_v58, 0.0  ;;  %v173_v15 = vunpack.c.l.bf16 %v165_v2  ;;  %v298_v50 = vld [vmem:[#allocation4 + $0x34] sm:$0x3] }
  0x70   :  { %v539_v8 = vrot.slane %v522_v61, 6  ;;  %v542_v9 = vrot.slane %v523_v62, 5  ;;  %v174_v19 = vunpack.c.l.bf16 %v166_v3  ;;  %v175_v20 = vunpack.c.l.bf16 %v167_v4 }
  0x71   :  { %v190_v22 = vunpack.c.l.bf16 %v182_v6  ;;  %v147_v23 = vrot.slane %v146_v10, 4  ;;  %v176_v60 = vunpack.c.l.bf16 %v168_v5  ;;  %v191_v25 = vunpack.c.l.bf16 %v183_v11 }
  0x72   :  { %v541_v18 = vsel %vm540_vm2, %v539_v8, %v538_v7  ;;  %v192_v26 = vunpack.c.l.bf16 %v184_v17  ;;  %v134_v1 = vadd.f32 %v133_v12, %v132_v59  ;;  %v141_v27 = vadd.f32 %v140_v13, %v139_v0 }
  0x73   :  { %v544_v55 = vsel %vm543_vm3, %v542_v9, %v541_v18  ;;  %v154_v28 = vrot.slane %v153_v14, 4  ;;  %v193_v29 = vunpack.c.l.bf16 %v185_v21  ;;  %v198_v31 = vsub.f32 %v173_v15, %v190_v22 }
  0x74   :  { %v553_v24 = vsel %vm103_vm0, %v544_v55, 0.0  ;;  %v199_v32 = vsub.f32 %v174_v19, %v191_v25  ;;  %v200_v16 = vsub.f32 %v175_v20, %v192_v26  ;;  %v148_v33 = vadd.f32 %v147_v23, %v146_v10 }
  0x75   :  { %554 = vadd.xlane.f32.xlu0 %v553_v24  ;;  %v201_v34 = vsub.f32 %v176_v60, %v193_v29  ;;  %v206_v35 = vmul.f32 %v198_v31, %v198_v31  ;;  %v135_v41 = vrot.slane %v134_v1, 2  ;;  %v142_v42 = vrot.slane %v141_v27, 2 }
  0x76   :  { %v207_v36 = vmul.f32 %v199_v32, %v199_v32  ;;  %v208_v37 = vmul.f32 %v200_v16, %v200_v16  ;;  %v155_v43 = vadd.f32 %v154_v28, %v153_v14  ;;  %v149_v51 = vrot.slane %v148_v33, 2 }
  0x77   :  { %v209_v44 = vmul.f32 %v201_v34, %v201_v34  ;;  %v238_v47 = vsel %vm103_vm0, %v206_v35, 0.0  ;;  %v287_v54 = vunpack.c.l.bf16 %v279_v30  ;;  %v288_v58 = vunpack.c.l.bf16 %v280_v38  ;;  %v394_v34 = vld [vmem:[#allocation2 + $0x3a] sm:$0x3]  ;;  %v395_v38 = vld [vmem:[#allocation2 + $0x3c] sm:$0x3] }
  0x78   :  { %v245_v48 = vsel %vm103_vm0, %v207_v36, 0.0  ;;  %v252_v49 = vsel %vm103_vm0, %v208_v37, 0.0  ;;  %v239_v52 = vrot.slane %v238_v47, 4  ;;  %v289_v59 = vunpack.c.l.bf16 %v281_v39 }
  0x79   :  { %v246_v53 = vrot.slane %v245_v48, 4  ;;  %v259_v57 = vsel %vm103_vm0, %v209_v44, 0.0  ;;  %v290_v61 = vunpack.c.l.bf16 %v282_v40  ;;  %v136_v62 = vadd.f32 %v135_v41, %v134_v1 }
  0x7a   :  { %v143_v63 = vadd.f32 %v142_v42, %v141_v27  ;;  %v156_v0 = vrot.slane %v155_v43, 2  ;;  %v253_v2 = vrot.slane %v252_v49, 4  ;;  %v304_v3 = vunpack.c.l.bf16 %v296_v45 }
  0x7b   :  { %v305_v4 = vunpack.c.l.bf16 %v297_v46  ;;  %v306_v5 = vunpack.c.l.bf16 %v298_v50  ;;  %v307_v6 = vunpack.c.l.bf16 %v299_v56  ;;  %v150_v7 = vadd.f32 %v149_v51, %v148_v33  ;;  %v393_v33 = vld [vmem:[#allocation2 + $0x38] sm:$0x3]  ;;  %v412_v50 = vld [vmem:[#allocation4 + $0x3c] sm:$0x3] }
  0x7c   :  { %v240_v8 = vadd.f32 %v239_v52, %v238_v47  ;;  %v247_v9 = vadd.f32 %v246_v53, %v245_v48  ;;  %v260_v10 = vrot.slane %v259_v57, 4  ;;  %v312_v11 = vsub.f32 %v287_v54, %v304_v3  ;;  %v410_v48 = vld [vmem:[#allocation4 + $0x38] sm:$0x3] }
  0x7d   :  { %v313_v12 = vsub.f32 %v288_v58, %v305_v4  ;;  %v314_v13 = vsub.f32 %v289_v59, %v306_v5  ;;  %v315_v14 = vsub.f32 %v290_v61, %v307_v6  ;;  %v137_v15 = vrot.slane %v136_v62, 1  ;;  %v413_v61 = vld [vmem:[#allocation4 + $0x3e] sm:$0x3] }
  0x7e   :  { %v144_v17 = vrot.slane %v143_v63, 1  ;;  %v157_v18 = vadd.f32 %v156_v0, %v155_v43  ;;  %v254_v19 = vadd.f32 %v253_v2, %v252_v49  ;;  %v320_v20 = vmul.f32 %v312_v11, %v312_v11  ;;  %v396_v43 = vld [vmem:[#allocation2 + $0x3e] sm:$0x3]  ;;  %v411_v49 = vld [vmem:[#allocation4 + $0x3a] sm:$0x3] }
  0x7f   :  { %v321_v21 = vmul.f32 %v313_v12, %v313_v12  ;;  %v322_v22 = vmul.f32 %v314_v13, %v314_v13  ;;  %v323_v55 = vmul.f32 %v315_v14, %v315_v14  ;;  %v151_v23 = vrot.slane %v150_v7, 1 }
  0x80   :  { %v241_v60 = vrot.slane %v240_v8, 2  ;;  %v248_v24 = vrot.slane %v247_v9, 2  ;;  %v261_v25 = vadd.f32 %v260_v10, %v259_v57  ;;  %v352_v26 = vsel %vm103_vm0, %v320_v20, 0.0 }
  0x81   :  { %v359_v1 = vsel %vm103_vm0, %v321_v21, 0.0  ;;  %v366_v27 = vsel %vm103_vm0, %v322_v22, 0.0  ;;  %v373_v28 = vsel %vm103_vm0, %v323_v55, 0.0  ;;  %v779_v29 = vadd.f32 %v137_v15, %v136_v62 }
  0x82   :  { %v781_v31 = vadd.f32 %v144_v17, %v143_v63  ;;  %v158_v32 = vrot.slane %v157_v18, 1  ;;  %v255_v16 = vrot.slane %v254_v19, 2  ;;  %v353_v30 = vrot.slane %v352_v26, 4 }
  0x83   :  { %v360_v35 = vrot.slane %v359_v1, 4  ;;  %v367_v36 = vrot.slane %v366_v27, 4  ;;  %v374_v37 = vrot.slane %v373_v28, 4  ;;  %v783_v39 = vadd.f32 %v151_v23, %v150_v7 }
  0x84   :  { %v242_v40 = vadd.f32 %v241_v60, %v240_v8  ;;  %v249_v41 = vadd.f32 %v248_v24, %v247_v9  ;;  %v262_v42 = vrot.slane %v261_v25, 2  ;;  %v354_v44 = vadd.f32 %v353_v30, %v352_v26 }
  0x85   :  { %v361_v45 = vadd.f32 %v360_v35, %v359_v1  ;;  %v368_v46 = vadd.f32 %v367_v36, %v366_v27  ;;  %v375_v47 = vadd.f32 %v374_v37, %v373_v28  ;;  %v159_v51 = vadd.f32 %v158_v32, %v157_v18 }
  0x86   :  { %v401_v52 = vunpack.c.l.bf16 %v393_v33  ;;  %v402_v53 = vunpack.c.l.bf16 %v394_v34  ;;  %v403_v54 = vunpack.c.l.bf16 %v395_v38  ;;  %v256_v56 = vadd.f32 %v255_v16, %v254_v19 }
  0x87   :  { %v355_v57 = vrot.slane %v354_v44, 2  ;;  %v362_v58 = vrot.slane %v361_v45, 2  ;;  %v369_v59 = vrot.slane %v368_v46, 2  ;;  %v404_v62 = vunpack.c.l.bf16 %v396_v43 }
  0x88   :  { %v418_v63 = vunpack.c.l.bf16 %v410_v48  ;;  %v419_v0 = vunpack.c.l.bf16 %v411_v49  ;;  %v420_v2 = vunpack.c.l.bf16 %v412_v50  ;;  %v243_v3 = vrot.slane %v242_v40, 1 }
  0x89   :  { %v250_v4 = vrot.slane %v249_v41, 1  ;;  %v263_v5 = vadd.f32 %v262_v42, %v261_v25  ;;  %v376_v6 = vrot.slane %v375_v47, 2  ;;  %v421_v7 = vunpack.c.l.bf16 %v413_v61 }
  0x8a   :  { %v426_v8 = vsub.f32 %v401_v52, %v418_v63  ;;  %v427_v9 = vsub.f32 %v402_v53, %v419_v0  ;;  %v428_v10 = vsub.f32 %v403_v54, %v420_v2  ;;  %v257_v11 = vrot.slane %v256_v56, 1 }
  0x8b   :  { %v356_v12 = vadd.f32 %v355_v57, %v354_v44  ;;  %v363_v13 = vadd.f32 %v362_v58, %v361_v45  ;;  %v370_v14 = vadd.f32 %v369_v59, %v368_v46  ;;  %v429_v15 = vsub.f32 %v404_v62, %v421_v7  ;;  %v503_v58 = vld [vmem:[#allocation6 + $0x4] sm:$0xf] }
  0x8c   :  { %v434_v17 = vmul.f32 %v426_v8, %v426_v8  ;;  %v435_v18 = vmul.f32 %v427_v9, %v427_v9  ;;  %v436_v19 = vmul.f32 %v428_v10, %v428_v10  ;;  %v244_v20 = vadd.f32 %v243_v3, %v242_v40 }
  0x8d   :  { %v251_v21 = vadd.f32 %v250_v4, %v249_v41  ;;  %v264_v22 = vrot.slane %v263_v5, 1  ;;  %v377_v55 = vadd.f32 %v376_v6, %v375_v47  ;;  %v437_v23 = vmul.f32 %v429_v15, %v429_v15 }
  0x8e   :  { %v466_v60 = vsel %vm103_vm0, %v434_v17, 0.0  ;;  %v473_v24 = vsel %vm103_vm0, %v435_v18, 0.0  ;;  %v480_v25 = vsel %vm103_vm0, %v436_v19, 0.0  ;;  %v258_v26 = vadd.f32 %v257_v11, %v256_v56 }
  0x8f   :  { %v357_v1 = vrot.slane %v356_v12, 1  ;;  %v364_v27 = vrot.slane %v363_v13, 1  ;;  %v371_v28 = vrot.slane %v370_v14, 1  ;;  %v467_v32 = vrot.slane %v466_v60, 4 }
  0x90   :  { %v474_v16 = vrot.slane %v473_v24, 4  ;;  %v481_v33 = vrot.slane %v480_v25, 4  ;;  %v487_v34 = vsel %vm103_vm0, %v437_v23, 0.0  ;;  %v265_v30 = vadd.f32 %v264_v22, %v263_v5 }
  0x91   :  { %v270_v35 = vadd.f32 %v244_v20, %v779_v29  ;;  %v378_v36 = vrot.slane %v377_v55, 1  ;;  %v488_v37 = vrot.slane %v487_v34, 4  ;;  %v271_v38 = vadd.f32 %v251_v21, %v781_v31 }
  0x92   :  { %v468_v40 = vadd.f32 %v467_v32, %v466_v60  ;;  %v475_v41 = vadd.f32 %v474_v16, %v473_v24  ;;  %v482_v42 = vadd.f32 %v481_v33, %v480_v25  ;;  %v272_v43 = vadd.f32 %v258_v26, %v783_v39 }
  0x93   :  { %v358_v44 = vadd.f32 %v357_v1, %v356_v12  ;;  %v365_v45 = vadd.f32 %v364_v27, %v363_v13  ;;  %v489_v46 = vadd.f32 %v488_v37, %v487_v34  ;;  %v372_v47 = vadd.f32 %v371_v28, %v370_v14 }
  0x94   :  { %v469_v48 = vrot.slane %v468_v40, 2  ;;  %v476_v49 = vrot.slane %v475_v41, 2  ;;  %v483_v50 = vrot.slane %v482_v42, 2  ;;  %v273_v52 = vadd.f32 %v265_v30, %v159_v51 }
  0x95   :  { %v379_v53 = vadd.f32 %v378_v36, %v377_v55  ;;  %v490_v54 = vrot.slane %v489_v46, 2  ;;  %v384_v31 = vadd.f32 %v358_v44, %v270_v35  ;;  %v385_v59 = vadd.f32 %v365_v45, %v271_v38 }
  0x96   :  { %v470_v29 = vadd.f32 %v469_v48, %v468_v40  ;;  %v477_v56 = vadd.f32 %v476_v49, %v475_v41  ;;  %v484_v57 = vadd.f32 %v483_v50, %v482_v42  ;;  %v386_v62 = vadd.f32 %v372_v47, %v272_v43 }
  0x97   :  { %v491_v61 = vadd.f32 %v490_v54, %v489_v46  ;;  %v387_v2 = vadd.f32 %v379_v53, %v273_v52  ;;  %v509_v4 = vrot.slane %v503_v58, 1  ;;  %v510_v51 = vrot.slane %v503_v58, 2 }
  0x98   :  { %v471_v63 = vrot.slane %v470_v29, 1  ;;  %v478_v39 = vrot.slane %v477_v56, 1  ;;  %v485_v0 = vrot.slane %v484_v57, 1  ;;  %v511_v9 = vrot.slane %v503_v58, 3 }
  0x99   :  { %v492_v3 = vrot.slane %v491_v61, 1  ;;  %vm559_vm4 = vcmask 1043456   ;;  %vm576_vm5 = vcmask 0  }
  0x9a   :  { %v472_v5 = vadd.f32 %v471_v63, %v470_v29  ;;  %v479_v6 = vadd.f32 %v478_v39, %v477_v56  ;;  %v486_v7 = vadd.f32 %v485_v0, %v484_v57 }
  0x9b   :  { %v493_v8 = vadd.f32 %v492_v3, %v491_v61 }
  0x9c   :  { %v498_v10 = vadd.f32 %v472_v5, %v384_v31  ;;  %v499_v11 = vadd.f32 %v479_v6, %v385_v59  ;;  %v500_v12 = vadd.f32 %v486_v7, %v386_v62 }
  0x9d   :  { %v501_v13 = vadd.f32 %v493_v8, %v387_v2 }
  0x9e   :  { %v524_v14 = vmul.f32 %v503_v58, %v498_v10  ;;  %v525_v15 = vmul.f32 %v509_v4, %v499_v11  ;;  %v526_v17 = vmul.f32 %v510_v51, %v500_v12 }
  0x9f   :  { %v527_v18 = vmul.f32 %v511_v9, %v501_v13 }
  0xa0   :  { %v545_v19 = vrot.slane %v525_v15, 7  ;;  %v547_v20 = vrot.slane %v526_v17, 6 }
  0xa1   :  { %v549_v21 = vrot.slane %v527_v18, 5 }
  0xa2   :  { %v546_v22 = vsel %vm537_vm1, %v545_v19, %v524_v14 }
  0xa3   :  { %v548_v55 = vsel %vm540_vm2, %v547_v20, %v546_v22 }
  0xa4   :  { %v550_v23 = vsel %vm543_vm3, %v549_v21, %v548_v55 }
  0xa5   :  { %v556_v60 = vsel %vm103_vm0, %v550_v23, 0.0 }
  0xa6   :  { %557 = vadd.xlane.f32.xlu0 %v556_v60 }
 0x102   :  { %v555_v24 = vpop.xlane.xlu0 %554 }
 0x103   :  { %v560_v25 = vsel %vm559_vm4, %v555_v24, 0.0 }
 0x104   :  { %v561_v26 = vrot.slane %v560_v25, 4 }
 0x106   :  { %v562_v1 = vadd.f32 %v561_v26, %v560_v25 }
 0x108   :  { %v563_v27 = vrot.slane %v562_v1, 2 }
 0x10a   :  { %v564_v28 = vadd.f32 %v563_v27, %v562_v1 }
 0x10c   :  { %v565_v32 = vrot.slane %v564_v28, 1 }
 0x10e   :  { %v566_v16 = vadd.f32 %v565_v32, %v564_v28 }
 0x110   :  { %v574_v33 = vmul.f32 0.25, %v566_v16 }
 0x112   :  { %577 = vst.msk [vmem:[%s805_s3] sm:$0x1] %vm576_vm5, %v574_v33 }
 0x133   :  { %v558_v34 = vpop.xlane.xlu0 %557 }
 0x134   :  { %v567_v30 = vsel %vm559_vm4, %v558_v34, 0.0 }
 0x135   :  { %v568_v35 = vrot.slane %v567_v30, 4 }
 0x137   :  { %v569_v36 = vadd.f32 %v568_v35, %v567_v30 }
 0x139   :  { %v570_v37 = vrot.slane %v569_v36, 2 }
 0x13b   :  { %v571_v38 = vadd.f32 %v570_v37, %v569_v36 }
 0x13d   :  { %v572_v40 = vrot.slane %v571_v38, 1 }
 0x13f   :  { %v573_v41 = vadd.f32 %v572_v40, %v571_v38 }
 0x141   :  { %v575_v42 = vmul.f32 0.25, %v573_v41 }
 0x143   :  { %578 = vst.msk [vmem:[%s805_s3 + $0x1] sm:$0x1] %vm576_vm5, %v575_v42 }
 0x144   :  { %583 = vsyncpa [#allocation3], 1 }
 0x145   :  { %584 = vsyncpa [#allocation5], 1 }

</bundles_post_ra>
